<compile_context>
chip_gen: v6e
topology: v6e:2x2x1
jax: 0.10.0
libtpu: 0.0.40
codegen_flags: <defaults>
</compile_context>

<pallas_src>
import functools

import jax
import jax.numpy as jnp
from jax.experimental import pallas as pl
from jax.experimental.pallas import tpu as pltpu


# ----------------------------------------------------------------------------
# In-kernel helpers
# ----------------------------------------------------------------------------
def _masked_log_softmax(fused, is_logit):
    """Log-softmax over the logit lanes only (f32); other lanes pass through.

    NOTE: the -1e30 sentinel and all softmax math must remain f32 (bf16 would
    saturate to -inf / NaN on the exp of masked lanes).
    """
    masked = jnp.where(is_logit, fused, jnp.float32(-1e30))
    m = jnp.max(masked, axis=1, keepdims=True)
    shifted = fused - m
    p = jnp.where(is_logit, jnp.exp(shifted), jnp.float32(0.0))
    lse = jnp.log(jnp.sum(p, axis=1, keepdims=True))
    return jnp.where(is_logit, shifted - lse, fused)


def rnn_cell_kernel(x_ref, h_ref, wx_ref, wh_ref, b_ref, slab_ref, *,
                    hidden_size, output_size):
    """One RNN step for one batch tile: writes the lane-dense (TB, P) slab
    [ new_hidden | log_probs | pad ]."""
    TB, P = slab_ref.shape
    col = jax.lax.broadcasted_iota(jnp.int32, (TB, P), 1)
    is_logit = (col >= hidden_size) & (col < hidden_size + output_size)
    wx = wx_ref[...]
    wh = wh_ref[...]
    fused = (jnp.dot(x_ref[...].astype(wx.dtype), wx,
                     preferred_element_type=jnp.float32)
             + jnp.dot(h_ref[...].astype(wh.dtype), wh,
                       preferred_element_type=jnp.float32)
             + b_ref[...])
    slab_ref[...] = _masked_log_softmax(fused, is_logit)


def rnn_seq_kernel(x_ref, h0_ref, wx_ref, whp_ref, b_ref, slab_ref, h_scratch,
                   *, hidden_size, output_size, chunk):
    """TT timesteps for one batch tile, time loop inside the kernel.

    Grid = (batch_tiles ["parallel"], time_chunks ["arbitrary"]).
    The hidden is carried full-width (TB, P) through the fori_loop; across
    time chunks it is carried in a small VMEM scratch.
    """
    ti = pl.program_id(1)

    @pl.when(ti == 0)
    def _():
        h_scratch[...] = h0_ref[...]                 # (TB, P) full-width carry

    TB, P = h_scratch.shape

    # ---- loop invariants hoisted out of the time loop ----
    wx = wx_ref[...]                                 # (I, P)
    whp = whp_ref[...]                               # (P, P), rows >= H are 0
    b_bcast = jnp.broadcast_to(b_ref[...], (TB, P))  # one broadcast, not T
    col = jax.lax.broadcasted_iota(jnp.int32, (TB, P), 1)
    is_logit = (col >= hidden_size) & (col < hidden_size + output_size)

    def step(t, carry):
        # carry is the previous full-width slab; since whp rows >= H are zero,
        # carry @ whp == hidden @ wh  (no sub-128-lane slice on the carry).
        fused = (jnp.dot(x_ref[t].astype(wx.dtype), wx,
                         preferred_element_type=jnp.float32)
                 + jnp.dot(carry.astype(whp.dtype), whp,
                           preferred_element_type=jnp.float32)
                 + b_bcast)
        slab = _masked_log_softmax(fused, is_logit)
        slab_ref[t] = slab                           # lane-dense 128-wide store
        return slab

    h_scratch[...] = jax.lax.fori_loop(0, chunk, step, h_scratch[...],
                                       unroll=True)


# ----------------------------------------------------------------------------
# Parameter packing
# ----------------------------------------------------------------------------
def pack_params(wh_t, bh, wo_t, bo, input_size, compute_dtype=jnp.float32):
    """Pack i2h/i2o weights into one lane-padded matrix, split along the input
    axis so concat(x, h) is never materialized.

    wh_t: (I+H, H), wo_t: (I+H, O), bh: (H,), bo: (O,)
    Returns:
      wx  : (I, P)   x-part of the fused weight
      wh  : (H, P)   h-part (single-step kernel)
      whp : (P, P)   h-part zero-padded to full slab width (sequence kernel)
      b   : (1, P)   fused bias (always f32)
    with P = roundup(H + O, 128).  compute_dtype=bf16 halves weight traffic
    and doubles MXU rate on v6e/v7x (softmax stays f32 either way).
    """
    IH, H = wh_t.shape
    O = wo_t.shape[1]
    P = pl.cdiv(H + O, 128) * 128
    w = jnp.zeros((IH, P), jnp.float32)
    w = w.at[:, :H].set(wh_t).at[:, H:H + O].set(wo_t)
    wx = w[:input_size].astype(compute_dtype)
    wh = w[input_size:].astype(compute_dtype)
    whp = jnp.zeros((P, P), compute_dtype).at[:H, :].set(wh)
    b = jnp.zeros((1, P), jnp.float32)
    b = b.at[0, :H].set(bh).at[0, H:H + O].set(bo)
    return wx, wh, whp, b


def _batch_tile(B, cap=128):
    """Largest sublane-dense batch tile dividing B, capped (vreg pressure)."""
    for tb in (cap, 128, 64, 32, 16, 8):
        if tb <= cap and B % tb == 0:
            return tb
    return B


def _time_chunk(T, cap=8):
    for tt in range(min(T, cap), 0, -1):
        if T % tt == 0:
            return tt
    return 1


# ----------------------------------------------------------------------------
# Wrappers
# ----------------------------------------------------------------------------
def rnn_forward(x, h, wx, wh, b, hidden_size, output_size, tb=None):
    """Single RNN step (matches the module's forward). x: (B, I), h: (B, H).
    Returns (log_probs (B, O), new_hidden (B, H))."""
    B, I = x.shape
    H, O = hidden_size, output_size
    P = b.shape[1]
    TB = tb if tb is not None else _batch_tile(B)
    assert B % TB == 0
    kernel = functools.partial(rnn_cell_kernel, hidden_size=H, output_size=O)
    slab = pl.pallas_call(
        kernel,
        grid=(B // TB,),
        in_specs=[
            pl.BlockSpec((TB, I), lambda i: (i, 0)),
            pl.BlockSpec((TB, H), lambda i: (i, 0)),
            pl.BlockSpec((I, P), lambda i: (0, 0)),    # weights VMEM-resident
            pl.BlockSpec((H, P), lambda i: (0, 0)),
            pl.BlockSpec((1, P), lambda i: (0, 0)),
        ],
        out_specs=pl.BlockSpec((TB, P), lambda i: (i, 0)),   # lane-dense slab
        out_shape=jax.ShapeDtypeStruct((B, P), jnp.float32),
        compiler_params=pltpu.CompilerParams(
            dimension_semantics=("parallel",)),        # batch shards on v7x
    )(x, h, wx, wh, b)
    return slab[:, H:H + O], slab[:, :H]


def rnn_forward_seq(x_seq, h0, wx, whp, b, hidden_size, output_size,
                    tb=None, tt=None):
    """Whole sequence; time loop inside the kernel, time chunks pipelined.
    x_seq: (T, B, I), h0: (B, H).
    Returns the packed slab (T, B, P) = [hidden_t | log_probs_t | pad];
    consumers may use it directly (slicing it is a wrapper-side choice)."""
    T, B, I = x_seq.shape
    H, O = hidden_size, output_size
    P = b.shape[1]
    TB = tb if tb is not None else _batch_tile(B)
    TT = tt if tt is not None else _time_chunk(T)
    assert B % TB == 0 and T % TT == 0
    # Full-width initial carry (columns >= H are ignored: whp rows >= H are 0).
    h0_pad = jnp.zeros((B, P), jnp.float32).at[:, :H].set(h0)
    kernel = functools.partial(rnn_seq_kernel, hidden_size=H, output_size=O,
                               chunk=TT)
    slab = pl.pallas_call(
        kernel,
        grid=(B // TB, T // TT),
        in_specs=[
            pl.BlockSpec((TT, TB, I), lambda bi, ti: (ti, bi, 0)),
            pl.BlockSpec((TB, P), lambda bi, ti: (bi, 0)),
            pl.BlockSpec((I, P), lambda bi, ti: (0, 0)),
            pl.BlockSpec((P, P), lambda bi, ti: (0, 0)),
            pl.BlockSpec((1, P), lambda bi, ti: (0, 0)),
        ],
        out_specs=pl.BlockSpec((TT, TB, P), lambda bi, ti: (ti, bi, 0)),
        out_shape=jax.ShapeDtypeStruct((T, B, P), jnp.float32),
        scratch_shapes=[pltpu.VMEM((TB, P), jnp.float32)],   # cross-chunk carry
        compiler_params=pltpu.CompilerParams(
            dimension_semantics=("parallel", "arbitrary")),  # time is serial
    )(x_seq, h0_pad, wx, whp, b)
    return slab


def init_params(key, input_size, hidden_size, output_size):
    """nn.Linear-style init: U(-1/sqrt(fan_in), 1/sqrt(fan_in)).
    Weights stored pre-transposed as (in_features, out_features)."""
    k1, k2, k3, k4 = jax.random.split(key, 4)
    fan_in = input_size + hidden_size
    bound = 1.0 / jnp.sqrt(jnp.float32(fan_in))
    wh_t = jax.random.uniform(k1, (fan_in, hidden_size), jnp.float32, -bound, bound)
    bh = jax.random.uniform(k2, (hidden_size,), jnp.float32, -bound, bound)
    wo_t = jax.random.uniform(k3, (fan_in, output_size), jnp.float32, -bound, bound)
    bo = jax.random.uniform(k4, (output_size,), jnp.float32, -bound, bound)
    return wh_t, bh, wo_t, bo


if __name__ == "__main__":
    input_size, hidden_size, output_size = 16, 32, 8
    batch, seq_len = 16, 8
    TB, TT = 8, 4          # 2 parallel batch tiles x 2 sequential time chunks

    key = jax.random.PRNGKey(0)
    kp, kx, ks = jax.random.split(key, 3)
    wh_t, bh, wo_t, bo = init_params(kp, input_size, hidden_size, output_size)
    wx, wh, whp, b = pack_params(wh_t, bh, wo_t, bo, input_size)

    x = jax.random.normal(kx, (batch, input_size), jnp.float32)
    h0 = jnp.zeros((batch, hidden_size), jnp.float32)   # RNN.initHidden per row

    H, O = hidden_size, output_size

    # ---- single-step kernel (matches the module's forward signature) ----
    out, hid = rnn_forward(x, h0, wx, wh, b, hidden_size, output_size, tb=TB)
    out, hid = jax.block_until_ready(out), jax.block_until_ready(hid)

    comb = jnp.concatenate([x, h0], axis=1)
    hid_ref = comb @ wh_t + bh
    out_ref = jax.nn.log_softmax(comb @ wo_t + bo, axis=1)
    assert jnp.allclose(out, out_ref, atol=1e-4), "single-step output mismatch"
    assert jnp.allclose(hid, hid_ref, atol=1e-4), "single-step hidden mismatch"

    # ---- whole-sequence kernel (time loop inside the kernel) ----
    x_seq = jax.random.normal(ks, (seq_len, batch, input_size), jnp.float32)
    slab = rnn_forward_seq(x_seq, h0, wx, whp, b, hidden_size, output_size,
                           tb=TB, tt=TT)
    slab = jax.block_until_ready(slab)
    out_seq = slab[:, :, H:H + O]           # verification-only slices
    h_final = slab[-1, :, :H]

    h_r = h0
    outs_r = []
    for t in range(seq_len):
        c = jnp.concatenate([x_seq[t], h_r], axis=1)
        outs_r.append(jax.nn.log_softmax(c @ wo_t + bo, axis=1))
        h_r = c @ wh_t + bh
    out_seq_ref = jnp.stack(outs_r)
    assert jnp.allclose(out_seq, out_seq_ref, atol=1e-4), "seq output mismatch"
    assert jnp.allclose(h_final, h_r, atol=1e-4), "seq hidden mismatch"

    print("KERNEL_OK")
</pallas_src>

<mosaic_0001>
module attributes {stable_mosaic.version = 11 : i64} {
  func.func @rnn_cell_kernel(%arg0: i32, %arg1: memref<8x16xf32, #tpu.memory_space<vmem>>, %arg2: memref<8x32xf32, #tpu.memory_space<vmem>>, %arg3: memref<16x128xf32, #tpu.memory_space<vmem>>, %arg4: memref<32x128xf32, #tpu.memory_space<vmem>>, %arg5: memref<1x128xf32, #tpu.memory_space<vmem>>, %arg6: memref<8x128xf32, #tpu.memory_space<vmem>>) attributes {dimension_semantics = [#tpu.dimension_semantics<parallel>], iteration_bounds = array<i64: 2>, scalar_prefetch = 0 : i64, scratch_operands = 0 : i64, tpu.core_type = #tpu.core_type<tc>, window_params = [{transform_indices = @transform_0, window_bounds = array<i64: 8, 16>}, {transform_indices = @transform_1, window_bounds = array<i64: 8, 32>}, {pipeline_mode = #tpu.pipeline_mode<synchronous>, transform_indices = @transform_2, window_bounds = array<i64: 16, 128>}, {pipeline_mode = #tpu.pipeline_mode<synchronous>, transform_indices = @transform_3, window_bounds = array<i64: 32, 128>}, {pipeline_mode = #tpu.pipeline_mode<synchronous>, transform_indices = @transform_4, window_bounds = array<i64: 1, 128>}, {transform_indices = @transform_5, window_bounds = array<i64: 8, 128>}]} {
    %0 = tpu.iota {dimensions = array<i32: 1>} : vector<8x128xi32>
    %c32_i32 = arith.constant 32 : i32
    %1 = vector.broadcast %c32_i32 : i32 to vector<8x128xi32>
    %2 = arith.cmpi sge, %0, %1 : vector<8x128xi32>
    %c40_i32 = arith.constant 40 : i32
    %3 = vector.broadcast %c40_i32 : i32 to vector<8x128xi32>
    %4 = arith.cmpi slt, %0, %3 : vector<8x128xi32>
    %5 = arith.andi %2, %4 : vector<8x128xi1>
    %c0 = arith.constant 0 : index
    %c0_0 = arith.constant 0 : index
    %6 = vector.load %arg3[%c0, %c0_0] : memref<16x128xf32, #tpu.memory_space<vmem>>, vector<16x128xf32>
    %c0_1 = arith.constant 0 : index
    %c0_2 = arith.constant 0 : index
    %7 = vector.load %arg4[%c0_1, %c0_2] : memref<32x128xf32, #tpu.memory_space<vmem>>, vector<32x128xf32>
    %c0_3 = arith.constant 0 : index
    %c0_4 = arith.constant 0 : index
    %8 = vector.load %arg1[%c0_3, %c0_4] : memref<8x16xf32, #tpu.memory_space<vmem>>, vector<8x16xf32>
    %cst = arith.constant dense<0.000000e+00> : vector<8x128xf32>
    %9 = tpu.matmul %8, %6, %cst {dimension_numbers = #tpu.dot_dimension_numbers<[1], [0], [0], [1], [0, 0, 1, 1], [], []>} : vector<8x16xf32>, vector<16x128xf32>, vector<8x128xf32> -> vector<8x128xf32>
    %c0_5 = arith.constant 0 : index
    %c0_6 = arith.constant 0 : index
    %10 = vector.load %arg2[%c0_5, %c0_6] : memref<8x32xf32, #tpu.memory_space<vmem>>, vector<8x32xf32>
    %cst_7 = arith.constant dense<0.000000e+00> : vector<8x128xf32>
    %11 = tpu.matmul %10, %7, %cst_7 {dimension_numbers = #tpu.dot_dimension_numbers<[1], [0], [0], [1], [0, 0, 1, 1], [], []>} : vector<8x32xf32>, vector<32x128xf32>, vector<8x128xf32> -> vector<8x128xf32>
    %12 = arith.addf %9, %11 : vector<8x128xf32>
    %c0_8 = arith.constant 0 : index
    %c0_9 = arith.constant 0 : index
    %13 = vector.load %arg5[%c0_8, %c0_9] : memref<1x128xf32, #tpu.memory_space<vmem>>, vector<1x128xf32>
    %14 = vector.broadcast %13 : vector<1x128xf32> to vector<8x128xf32>
    %15 = arith.addf %12, %14 : vector<8x128xf32>
    %cst_10 = arith.constant -1.000000e+30 : f32
    %16 = vector.broadcast %cst_10 : f32 to vector<8x128xf32>
    %17 = arith.select %5, %15, %16 : vector<8x128xi1>, vector<8x128xf32>
    %cst_11 = arith.constant dense<0xFF800000> : vector<8xf32>
    %18 = vector.multi_reduction <maximumf>, %17, %cst_11 [1] : vector<8x128xf32> to vector<8xf32>
    %19 = vector.shape_cast %18 : vector<8xf32> to vector<8x1xf32>
    %20 = vector.broadcast %19 : vector<8x1xf32> to vector<8x128xf32>
    %21 = arith.subf %15, %20 : vector<8x128xf32>
    %22 = math.exp %21 : vector<8x128xf32>
    %cst_12 = arith.constant 0.000000e+00 : f32
    %23 = vector.broadcast %cst_12 : f32 to vector<8x128xf32>
    %24 = arith.select %5, %22, %23 : vector<8x128xi1>, vector<8x128xf32>
    %cst_13 = arith.constant dense<0.000000e+00> : vector<8xf32>
    %25 = vector.multi_reduction <add>, %24, %cst_13 [1] : vector<8x128xf32> to vector<8xf32>
    %26 = vector.shape_cast %25 : vector<8xf32> to vector<8x1xf32>
    %27 = math.log %26 : vector<8x1xf32>
    %28 = vector.broadcast %27 : vector<8x1xf32> to vector<8x128xf32>
    %29 = arith.subf %21, %28 : vector<8x128xf32>
    %30 = arith.select %5, %29, %15 : vector<8x128xi1>, vector<8x128xf32>
    %c0_14 = arith.constant 0 : index
    %c0_15 = arith.constant 0 : index
    %31 = vector.load %arg6[%c0_14, %c0_15] : memref<8x128xf32, #tpu.memory_space<vmem>>, vector<8x128xf32>
    tpu.vector_store %arg6[%c0_14, %c0_15], %30 {strides = array<i32>} : memref<8x128xf32, #tpu.memory_space<vmem>>, vector<8x128xf32>,
    return
  }
  func.func @transform_0(%arg0: i32) -> (i32, i32) {
    %c0_i32 = arith.constant 0 : i32
    %c0_i32_0 = arith.constant 0 : i32
    return %arg0, %c0_i32 : i32, i32
  }
  func.func @transform_1(%arg0: i32) -> (i32, i32) {
    %c0_i32 = arith.constant 0 : i32
    %c0_i32_0 = arith.constant 0 : i32
    return %arg0, %c0_i32 : i32, i32
  }
  func.func @transform_2(%arg0: i32) -> (i32, i32) {
    %c0_i32 = arith.constant 0 : i32
    %c0_i32_0 = arith.constant 0 : i32
    %c0_i32_1 = arith.constant 0 : i32
    return %c0_i32, %c0_i32_0 : i32, i32
  }
  func.func @transform_3(%arg0: i32) -> (i32, i32) {
    %c0_i32 = arith.constant 0 : i32
    %c0_i32_0 = arith.constant 0 : i32
    %c0_i32_1 = arith.constant 0 : i32
    return %c0_i32, %c0_i32_0 : i32, i32
  }
  func.func @transform_4(%arg0: i32) -> (i32, i32) {
    %c0_i32 = arith.constant 0 : i32
    %c0_i32_0 = arith.constant 0 : i32
    %c0_i32_1 = arith.constant 0 : i32
    return %c0_i32, %c0_i32_0 : i32, i32
  }
  func.func @transform_5(%arg0: i32) -> (i32, i32) {
    %c0_i32 = arith.constant 0 : i32
    %c0_i32_0 = arith.constant 0 : i32
    return %arg0, %c0_i32 : i32, i32
  }
}

</mosaic_0001>

<bundles_post_ra>
// kernel: tpu_custom_call.1
= control target key start
LH: loop header
LB: loop body
LE: loop exit
PB: predicated region body
PF: predicated region fallthrough
CT: control target
= control target key end

     0   :  { %s1208_s0 = inlined_call_operand.hbm [shape: f32[16,16], index: 0, kind: input, shape index: {}]   ;;  %s1209_s1 = inlined_call_operand.hbm [shape: f32[16,32], index: 1, kind: input, shape index: {}]   ;;  %s1210_s2 = inlined_call_operand.hbm [shape: f32[16,128], index: 2, kind: input, shape index: {}]   ;;  %s1211_s3 = inlined_call_operand.hbm [shape: f32[32,128], index: 3, kind: input, shape index: {}]   ;;  %s1212_s4 = inlined_call_operand.vmem [shape: f32[1,128], index: 4, kind: input, shape index: {}]   ;;  %s1213_s5 = inlined_call_operand.hbm [shape: f32[16,128], index: 5, kind: output, shape index: {}]  }
   0x1   :  { %1218 = sst [smem:[#allocation16_spill]] %s1210_s2 }
   0x2   :  { %1219 = sst [smem:[#allocation17_spill]] %s1211_s3 }
   0x3   :  { %10 = vsyncpa [#allocation3], 0 }
   0x4   :  { %12 = vsyncpa [#allocation3 + $0x1], 0 }
   0x5   :  { %13 = vsyncpa [#allocation6], 0 }
   0x6   :  { %15 = vsyncpa [#allocation6 + $0x1], 0 }
   0x7   :  { %16 = vsyncpa [#allocation9], 0 }
   0x8   :  { %17 = vsyncpa [#allocation4], 0 }
   0x9   :  { %19 = vsyncpa [#allocation4 + $0x1], 0  ;;  %s968_s18 = smov 0   ;;  %s970_s19 = smov 0  }
   0xa   :  { %s972_s20 = smov 0   ;;  %s974_s21 = smov 0  }
   0xb LB: > { %s989_s22 = sadd.s32 4294967295, %s927_s21   ;;  %s615_s23 = sadd.s32 4294967294, %s927_s21   ;;  %s927_s21 = sphi %s974_s21, %s1243_s21   ;;  %s923_s20 = sphi %s972_s20, %s1242_s20   ;;  %s919_s19 = sphi %s970_s19, %s1241_s19   ;;  %s915_s18 = sphi %s968_s18, %s1240_s18  }
   0xc   : > { %p45_p0 = scmp.ne.s32.totalorder %s919_s19, %s915_s18  ;;  %p1214_p1 = scmp.eq.s32.totalorder %s989_s22, 0 }
   0xd   : > { %p164_p3 = scmp.eq.s32.totalorder %s615_s23, 1  ;;  %p616_p5 = scmp.ge.s32.totalorder %s927_s21, 1 }
   0xe   : > { %p998_p4 = por %p1214_p1, %p45_p0  ;;  %p171_p7 = scmp.lt.s32.totalorder %s927_s21, 3 }
   0xf   : > { %p1003_p6 = por %p164_p3, %p45_p0  ;;  %s929_s27 = smov [#allocation7]  }
  0x10   : > { %s1220_s24 = scalar_select %p998_p4, 1, 0 }
  0x11   : > { %s1221_s25 = scalar_select %p1003_p6, 1, 0 }
  0x12   : > { %p1008_p8 = pnand %p616_p5, %p171_p7  ;;  %s183_s28 = sshll.u32 %s929_s27, 4  ;;  %s184_s28 = int_to_ptr.vmem [resolvable:$true] %s183_s28 }
  0x13   : > { %s930_s30 = smov [#allocation8]   ;;  %s754_s7 = scalar_lea.vmem %s184_s28, 256 }
  0x14   : > { %s1222_s26 = scalar_select %p1008_p8, 1, 0 }
  0x15   : > { %p677_p9 = pneg %p1008_p8  ;;  %s196_s6 = sshll.u32 %s930_s30, 4  ;;  %s197_s6 = int_to_ptr.vmem [resolvable:$true] %s196_s6 }
  0x16   : > { %p755_p13 = scmp.ne.s32.totalorder %s184_s28, %s754_s7  ;;  %p762_p5 = scmp.lt.s32.totalorder %s184_s28, %s184_s28 }
  0x17   : > { %p1017_p11 = pnand %p677_p9, %p1214_p1  ;;  %p763_p7 = scmp.lt.s32.totalorder %s754_s7, %s754_s7 }
  0x19   : > { %p745_p12 = pneg %p1017_p11  ;;  %p764_p10 = por %p763_p7, %p762_p5 }
  0x1b   : > { %p757_p0 = pnand %p755_p13, %p745_p12 }
  0x1d   : > { %p758_p3 = pneg %p757_p0 }
  0x1f   : > { %p765_p9 = pnand %p764_p10, %p758_p3 }
  0x21   : > { %768 = shalt.err (!%p765_p9)
}
  0x22   : > { %s931_s8 = smov 128   ;;  %s932_s9 = smov 8  }
  0x23   : > { %s1224_s2 = sld [smem:[#allocation16_spill]]  ;;  %s780_s12 = scalar_lea.vmem %s197_s6, 512 }
  0x24   : > { %p781_p1 = scmp.ne.s32.totalorder %s197_s6, %s780_s12  ;;  %p788_p2 = scmp.lt.s32.totalorder %s197_s6, %s197_s6 }
  0x25   : > { %p789_p6 = scmp.lt.s32.totalorder %s780_s12, %s780_s12 }
  0x26   : > { %p783_p13 = pnand %p781_p1, %p745_p12 }
  0x27   : > { %p790_p5 = por %p789_p6, %p788_p2 }
  0x28   : > { %p784_p0 = pneg %p783_p13 }
  0x29   : > { %680 = dma.hbm_to_vmem [thread:$0]  (!%p1017_p11), %s1224_s2, 256, %s184_s28, [#allocation6], %s931_s8, %s931_s8, %s932_s9  }
  0x2a   : > { %p791_p10 = pnand %p790_p5, %p784_p0 }
  0x2c   : > { %794 = shalt.err (!%p791_p10)
}
  0x2d   : > { %s1225_s3 = sld [smem:[#allocation17_spill]]  ;;  %s1040_s15 = sadd.s32 1, %s927_s21  }
  0x2e   : > { %s32_s16 = sadd.s32 1, %s923_s20  ;;  %s29_s17 = ssub.s32 %s927_s21, %s1040_s15 }
  0x2f   : > { %p39_p1 = scmp.ne.s32.totalorder %s923_s20, %s919_s19  ;;  %p30_p2 = scmp.eq.s32.totalorder %s29_s17, 0 }
  0x30   : > { %p40_p6 = scmp.eq.s32.totalorder %s927_s21, 0  ;;  %p1226_p12 = scmp.eq.s32.totalorder %s989_s22, 1 }
  0x31   : > { %p697_p7 = scmp.lt.s32.totalorder %s927_s21, 2  ;;  %s213_s28 = sand.u32 1, %s923_s20  }
  0x32   : > { %p1050_p3 = por %p1226_p12, %p39_p1  ;;  %p41_p9 = por %p40_p6, %p39_p1 }
  0x33   : > { %683 = dma.hbm_to_vmem [thread:$0]  (!%p1017_p11), %s1225_s3, 512, %s197_s6, [#allocation9], %s931_s8, %s931_s8, %s932_s9  }
  0x34   : > { %s1227_s23 = scalar_select %p1050_p3, 1, 0 }
  0x35   : > { %s1056_s27 = scalar_select %p30_p2, %s923_s20, %s32_s16  }
  0x36   : > { %s1059_s29 = sshll.u32 %s213_s28, 3  ;;  %s621_s30 = sshll.u32 %s927_s21, 7 }
  0x37   : > { %s1065_s8 = scalar_lea.hbm %s1208_s0, %s621_s30  ;;  %s217_s9 = scalar_lea.vmem [#allocation2], %s1059_s29 }
  0x38   : > { %s224_s10 = sshll.u32 %s217_s9, 4  ;;  %p1070_p11 = pnand %p697_p7, %p41_p9  ;;  %s1068_s10 = int_to_ptr.vmem [resolvable:$true] %s224_s10 }
  0x39   : > { %s1077_s14 = scalar_lea.hbm %s1209_s1, %s621_s30  ;;  %s231_s16 = sand.u32 1, %s927_s21  }
  0x3a   : > { %s214_s17 = scalar_lea.sflag [#allocation3], %s213_s28  ;;  %s795_s6 = scalar_lea.hbm %s1065_s8, 128 }
  0x3b   : > { %p796_p13 = scmp.ne.s32.totalorder %s1065_s8, %s795_s6  ;;  %p797_p0 = pneg %p1070_p11 }
  0x3c   : > { %s800_s2 = scalar_lea.hbm %s1208_s0, 256  ;;  %p801_p1 = scmp.lt.s32.totalorder %s1065_s8, %s1208_s0 }
  0x3d   : > { %p798_p5 = pnand %p797_p0, %p796_p13  ;;  %p802_p2 = scmp.lt.s32.totalorder %s800_s2, %s795_s6 }
  0x3f   : > { %p799_p10 = pneg %p798_p5  ;;  %p803_p6 = por %p802_p2, %p801_p1 }
  0x41   : > { %p804_p12 = pnand %p803_p6, %p799_p10 }
  0x43   : > { %807 = shalt.err (!%p804_p12)
}
  0x44   : > { %s808_s28 = scalar_lea.vmem %s1068_s10, 128  ;;  %s933_s30 = smov [#allocation2]  }
  0x45   : > { %p809_p7 = scmp.ne.s32.totalorder %s1068_s10, %s808_s28  ;;  %s813_s13 = sshll.u32 %s933_s30, 4  ;;  %s814_s13 = int_to_ptr.vmem [resolvable:$false] %s813_s13 }
  0x46   : > { %s815_s7 = scalar_lea.vmem %s814_s13, 256  ;;  %p816_p5 = scmp.lt.s32.totalorder %s1068_s10, %s814_s13 }
  0x47   : > { %p811_p9 = pnand %p809_p7, %p797_p0  ;;  %p817_p3 = scmp.lt.s32.totalorder %s815_s7, %s808_s28 }
  0x49   : > { %p812_p13 = pneg %p811_p9  ;;  %p818_p4 = por %p817_p3, %p816_p5 }
  0x4b   : > { %p819_p1 = pnand %p818_p4, %p812_p13 }
  0x4d   : > { %822 = shalt.err (!%p819_p1)
}
  0x4e   : > { %687 = dma.hbm_to_vmem [thread:$0]  (!%p1070_p11), %s1065_s8, 128, %s1068_s10, %s214_s17  }
  0x4f   : > { %s235_s2 = scalar_lea.vmem [#allocation5], %s1059_s29  ;;  %s232_s6 = scalar_lea.sflag [#allocation6], %s231_s16 }
  0x50   : > { %s242_s3 = sshll.u32 %s235_s2, 4  ;;  %s823_s9 = scalar_lea.hbm %s1077_s14, 128  ;;  %s243_s3 = int_to_ptr.vmem [resolvable:$true] %s242_s3 }
  0x51   : > { %p824_p3 = scmp.ne.s32.totalorder %s1077_s14, %s823_s9  ;;  %s828_s30 = scalar_lea.hbm %s1209_s1, 256 }
  0x52   : > { %p829_p2 = scmp.lt.s32.totalorder %s1077_s14, %s1209_s1  ;;  %p830_p6 = scmp.lt.s32.totalorder %s828_s30, %s823_s9 }
  0x53   : > { %p826_p4 = pnand %p824_p3, %p797_p0 }
  0x54   : > { %p831_p12 = por %p830_p6, %p829_p2 }
  0x55   : > { %p827_p10 = pneg %p826_p4 }
  0x57   : > { %p832_p7 = pnand %p831_p12, %p827_p10 }
  0x59   : > { %835 = shalt.err (!%p832_p7)
}
  0x5a   : > { %s836_s29 = scalar_lea.vmem %s243_s3, 128  ;;  %s934_s8 = smov [#allocation5]  }
  0x5b   : > { %p837_p9 = scmp.ne.s32.totalorder %s243_s3, %s836_s29  ;;  %s841_s10 = sshll.u32 %s934_s8, 4  ;;  %s842_s10 = int_to_ptr.vmem [resolvable:$false] %s841_s10 }
  0x5c   : > { %s843_s16 = scalar_lea.vmem %s842_s10, 256  ;;  %p844_p1 = scmp.lt.s32.totalorder %s243_s3, %s842_s10 }
  0x5d   : > { %p839_p13 = pnand %p837_p9, %p797_p0  ;;  %p845_p3 = scmp.lt.s32.totalorder %s843_s16, %s836_s29 }
  0x5f   : > { %p840_p5 = pneg %p839_p13  ;;  %p846_p4 = por %p845_p3, %p844_p1 }
  0x61   : > { %p847_p8 = pnand %p846_p4, %p840_p5 }
  0x63   : > { %850 = shalt.err (!%p847_p8)
}
  0x64   : > { %690 = dma.hbm_to_vmem [thread:$0]  (!%p1070_p11), %s1077_s14, 128, %s243_s3, %s232_s6  }
  0x65   : > { %p1229_p10 = scmp.ne.s32.totalorder %s1222_s26, 0 }
  0x66   : > { %s1128_s17 = sand.u32 (!%p1229_p10), 1, %s919_s19   ;;  %p1230_p0 = scmp.ne.s32.totalorder (!%p1229_p10), %s1220_s24, 0 }
  0x67   : > { %251 = sbr.rel (%p1229_p10) target bundleno = 653 (0x28d), region = 40  ;;  %s1131_s2 = sshll.u32 (!%p1229_p10), %s1128_s17, 3 }
  0x68   : > { %s254_s9 = scalar_lea.sflag (!%p1229_p10), [#allocation3], %s1128_s17  ;;  %s257_s12 = scalar_lea.vmem (!%p1229_p10), [#allocation2], %s1131_s2 }
  0x6c   : > { %894 = dma.done.wait (%p1230_p0), %s254_s9, 128  }
  0x6d   : > { %896 = vsyncadd (%p1230_p0), %s254_s9, 4294967168  ;;  %s262_s26 = sand.u32 1, %s989_s22   ;;  %s266_s14 = scalar_lea.vmem [#allocation5], %s1131_s2 }
  0x6e   : > { %s263_s11 = scalar_lea.sflag [#allocation6], %s262_s26 }
  0x6f   : > { %898 = dma.done.wait (%p1230_p0), %s263_s11, 128  }
  0x70   : > { %900 = vsyncadd (%p1230_p0), %s263_s11, 4294967168  ;;  %p1231_p8 = scmp.eq.s32.totalorder %s989_s22, 0 }
  0x72   : > { %902 = dma.done.wait (%p1231_p8), [#allocation6], 256   ;;  %p1232_p11 = pmov %p1231_p8 }
  0x73   : > { %p1233_p2 = pmov %p1231_p8 }
  0x74   : > { %904 = vsyncadd (%p1232_p11), [#allocation6], 4294967040 }
  0x75   : > { %906 = dma.done.wait (%p1233_p2), [#allocation9], 512   ;;  %p1234_p6 = pmov %p1233_p2 }
  0x76   : > { %v935_v0 = vmov 0.0   ;;  %vm936_vm0 = vmmov 0   ;;  %v316_v1 = vld [vmem:[#allocation8 + $0x18] sm:$0xff]  ;;  %v315_v2 = vld [vmem:[#allocation8 + $0x10] sm:$0xff]  ;;  %vm393_vm1 = vcmask 130048   ;;  %v314_v6 = vld [vmem:[#allocation8 + $0x8] sm:$0xff]  ;;  %v306_v9 = vlaneseq }
  0x77   : > { %908 = vsyncadd (%p1234_p6), [#allocation9], 4294966784  ;;  %645 = vmatprep.subr.mxu0 %v935_v0  ;;  %656 = vmatprep.subr.mxu1 %v935_v0  ;;  %v312_v3 = vld [vmem:[#allocation7 + $0x8] sm:$0xff]  ;;  %v311_v4 = vld [vmem:[#allocation7] sm:$0xff]  ;;  %vm319_vm2 = vcmask 261120   ;;  %s634_s6 = sshll.u32 %s989_s22, 7 }
  0x78   : > { %660 = vmatprep.mubr.msk.f32.mxu1 %vm936_vm0, %v935_v0  ;;  %653 = vmatprep.mubr.msk.f32.mxu0 %vm936_vm0, %v935_v0  ;;  %v317_v5 = vld [vmem:[%s257_s12] sm:$0xff]  ;;  %v313_v7 = vld [vmem:[#allocation8] sm:$0xff]  ;;  %v307_v10 = vand.u32 127, %v306_v9  ;;  %s305_s28 = scalar_lea.vmem [#allocation10], %s1131_s2  ;;  %s1169_s29 = scalar_lea.hbm %s1213_s5, %s634_s6 }
  0x79   : > { %646 = vmatpush3.msra.mxu0 %v316_v1  ;;  %657 = vmatpush3.msra.mxu1 %v312_v3  ;;  %v318_v8 = vld [vmem:[%s266_s14] sm:$0xff]  ;;  %v632_v14 = vld [vmem:[%s1212_s4] ss:$0 sm:$0xff]  ;;  %s503_s30 = sshll.u32 %s305_s28, 4  ;;  %s490_s8 = scalar_lea.sflag [#allocation4], %s1128_s17  ;;  %s504_s30 = int_to_ptr.vmem [resolvable:$true] %s503_s30 }
  0x7a   : > { %647 = vmatprep.subr.mxu0 %v935_v0  ;;  %658 = vmatprep.subr.mxu1 %v935_v0  ;;  %vm308_vm3 = vcmp.ge.s32.totalorder %v307_v10, 32  ;;  %vm309_vm4 = vcmp.lt.s32.totalorder %v307_v10, 40  ;;  %s851_s10 = scalar_lea.vmem %s504_s30, 128  ;;  %p1237_p7 = scmp.ne.s32.totalorder %s1227_s23, 0 }
  0x7b   : > { %648 = vmatpush3.msra.mxu0 %v315_v2  ;;  %659 = vmatpush3.msra.mxu1 %v311_v4  ;;  %vm1156_vm5 = vmand %vm308_vm3, %vm309_vm4  ;;  %p852_p12 = scmp.ne.s32.totalorder %s504_s30, %s851_s10  ;;  %s937_s22 = smov [#allocation10]  }
  0x7c   : > { %649 = vmatprep.subr.mxu0 %v935_v0  ;;  %661 = vmatmul.mubr.msk.f32.vlgmr.msra.gmra.mxu1 %vm393_vm1, %v317_v5  ;;  %s855_s16 = sshll.u32 %s937_s22, 4  ;;  %s856_s16 = int_to_ptr.vmem [resolvable:$false] %s855_s16 }
  0x7d   : > { %650 = vmatpush3.msra.mxu0 %v314_v6  ;;  %p853_p9 = pnand %p852_p12, %p1237_p7  ;;  %s857_s2 = scalar_lea.vmem %s856_s16, 256 }
  0x7e   : > { %651 = vmatprep.subr.mxu0 %v935_v0  ;;  %p858_p5 = scmp.lt.s32.totalorder %s504_s30, %s856_s16  ;;  %p859_p1 = scmp.lt.s32.totalorder %s857_s2, %s851_s10 }
  0x7f   : > { %652 = vmatpush3.msra.mxu0 %v313_v7  ;;  %p854_p13 = pneg %p853_p9 }
  0x80   : > { %654 = vmatmul.mubr.msk.f32.vlgmr.msra.gmra.mxu0 %vm319_vm2, %v318_v8  ;;  %p860_p3 = por %p859_p1, %p858_p5 }
  0x82   : > { %p861_p4 = pnand %p860_p3, %p854_p13 }
 0x13c   : > { %v463_v11 = vpop.f32.mrf.mxu1 }
 0x13e   : > { %v662_v12 = vpop.f32.mrf.mxu1 }
 0x140   : > { %v389_v13 = vpop.f32.mrf.mxu0 }
 0x141   : > { %v464_v15 = vadd.f32 %v463_v11, %v389_v13 }
 0x142   : > { %v655_v16 = vpop.f32.mrf.mxu0 }
 0x143   : > { %v474_v18 = vadd.f32 %v632_v14, %v464_v15 }
 0x145   : > { %v475_v19 = vsel %vm1156_vm5, %v474_v18, -1e+30 }
 0x146   : > { %476 = vmax.xlane.f32.xlu0 %v475_v19 }
 0x1cf   : > { %v477_v20 = vpop.xlane.xlu0 %476 }
 0x1d0   : > { %v478_v21 = vsub.f32 %v474_v18, %v477_v20 }
 0x1d2   : > { %v479_v22 = vmul.f32 1.442695, %v478_v21 }
 0x1d4   : > { %739 = vpow2.f32 %v479_v22 }
 0x1e1   : > { %v740_v23 = vpop.eup %739 }
 0x1e2   : > { %v481_v24 = vsel %vm1156_vm5, %v740_v23, 0.0 }
 0x1e3   : > { %482 = vadd.xlane.f32.xlu0 %v481_v24 }
 0x26c   : > { %v483_v25 = vpop.xlane.xlu0 %482 }
 0x26d   : > { %741 = vlog2.f32 %v483_v25 }
 0x27a   : > { %v742_v26 = vpop.eup %741 }
 0x27b   : > { %v485_v27 = vmul.f32 0.6931472, %v742_v26 }
 0x27d   : > { %v486_v28 = vsub.f32 %v478_v21, %v485_v27 }
 0x27f   : > { %v487_v29 = vsel %vm1156_vm5, %v486_v28, %v474_v18 }
 0x280   : > { %488 = vst [vmem:[%s305_s28] sm:$0xff] %v487_v29 }
 0x281   : > { %864 = shalt.err (!%p861_p4)
}
 0x282   : > { %s865_s9 = scalar_lea.hbm %s1169_s29, 128  ;;  %s869_s26 = scalar_lea.hbm %s1213_s5, 256 }
 0x283   : > { %p866_p10 = scmp.ne.s32.totalorder %s1169_s29, %s865_s9  ;;  %p870_p11 = scmp.lt.s32.totalorder %s1169_s29, %s1213_s5 }
 0x284   : > { %p871_p2 = scmp.lt.s32.totalorder %s869_s26, %s865_s9 }
 0x285   : > { %p867_p0 = pnand %p866_p10, %p1237_p7 }
 0x286   : > { %p872_p6 = por %p871_p2, %p870_p11 }
 0x287   : > { %p868_p8 = pneg %p867_p0 }
 0x289   : > { %p873_p12 = pnand %p872_p6, %p868_p8 }
 0x28b   : > { %876 = shalt.err (!%p873_p12)
}
 0x28c   : > { %675 = dma.vmem_to_hbm [thread:$0]  (%p1237_p7), %s504_s30, 128, %s1169_s29, %s490_s8  }
 0x28d PF: > { %s515_s24 = sand.u32 1, %s915_s18   ;;  %p1238_p9 = scmp.ne.s32.totalorder %s1221_s25, 0 }
 0x28e   : > { %p1239_p13 = scmp.ge.s32.totalorder %s927_s21, 2  ;;  %s516_s3 = scalar_lea.sflag [#allocation4], %s515_s24 }
 0x290   : > { %p692_p5 = pnand %p1239_p13, %p1238_p9 }
 0x292   : > { %p693_p1 = pneg %p692_p5 }
 0x294   : > { %910 = dma.done.wait (%p693_p1), %s516_s3, 128  }
 0x295   : > { %912 = vsyncadd (%p693_p1), %s516_s3, 4294967168  ;;  %p22_p3 = scmp.ge.s32.totalorder %s1040_s15, 4   ;;  %s1240_s18 = smov %s919_s19 }
 0x296   : > { %s1241_s19 = smov %s923_s20  ;;  %s1242_s20 = smov %s1056_s27 }
 0x297   : > { %s1243_s21 = smov %s1040_s15  ;;  %24 = sbr.rel (!%p22_p3) target bundleno = 11 (0xb), region = 106 }
 0x29c   :  { %521 = vsyncpa [#allocation3], 1 }
 0x29d   :  { %523 = vsyncpa [#allocation3 + $0x1], 1 }
 0x29e   :  { %524 = vsyncpa [#allocation6], 1 }
 0x29f   :  { %526 = vsyncpa [#allocation6 + $0x1], 1 }
 0x2a0   :  { %527 = vsyncpa [#allocation9], 1 }
 0x2a1   :  { %528 = vsyncpa [#allocation4], 1 }
 0x2a2   :  { %530 = vsyncpa [#allocation4 + $0x1], 1 }

</bundles_post_ra>
